<compile_context>
chip_gen: v5e
topology: v5e:2x2
jax: 0.10.0
libtpu: 0.0.40
codegen_flags: <defaults>
</compile_context>

<pallas_src>
import jax
import jax.numpy as jnp
from jax.experimental import pallas as pl
from jax.experimental.pallas import tpu as pltpu


# --------------------------------------------------------------------------
# Kernels
# --------------------------------------------------------------------------
def _make_channel_chunk_kernel(B, num_c_chunks, HW):
    """Primary path. Blocks: x (B, c_chunk, HW), w1t (c_chunk, hidden),
    w2t (hidden, C). Accumulates fc1 pre-activations across channel chunks
    (the fc1 contraction is linear in C, so relu waits for the last chunk)."""
    inv_hw = 1.0 / float(HW)

    def kernel(x_ref, w1t_ref, w2t_ref, o_ref, h_acc):
        c = pl.program_id(1)

        @pl.when(c == 0)
        def _init():
            h_acc[...] = jnp.zeros_like(h_acc)

        x = x_ref[...]                                             # (B, cc, HW) native
        # One-shot spatial reduce: no masking, no carried reduction state.
        avg = jnp.sum(x.astype(jnp.float32), axis=-1) * inv_hw     # (B, cc) f32
        mx = jnp.max(x, axis=-1).astype(jnp.float32)               # (B, cc) f32
        w1blk = w1t_ref[...].astype(jnp.float32)                   # (cc, hidden)
        # Partial fc1 contraction over this channel chunk (pre-relu, linear).
        h_acc[0:B, :] += jnp.dot(avg, w1blk, preferred_element_type=jnp.float32)
        h_acc[B:2 * B, :] += jnp.dot(mx, w1blk, preferred_element_type=jnp.float32)

        @pl.when(c == num_c_chunks - 1)
        def _finalize():
            h = jnp.maximum(h_acc[...], 0.0)                       # (2B, hidden)
            y = jnp.dot(h, w2t_ref[...].astype(jnp.float32),
                        preferred_element_type=jnp.float32)        # (2B, C)
            att = jax.nn.sigmoid(y[0:B] + y[B:2 * B])              # (B, C)
            o_ref[0] = att.astype(o_ref.dtype)

    return kernel


def _make_hw_chunk_kernel(B, C, HW, hw_chunk, num_chunks):
    """Fallback path for very large H*W. Blocks: x (B, C, hw_chunk),
    w1t (C, hidden), w2t (hidden, C). Running f32 sum / max over H*W chunks;
    the tail mask is paid only on the final partial chunk."""
    inv_hw = 1.0 / float(HW)
    needs_mask = (num_chunks * hw_chunk) != HW

    def kernel(x_ref, w1t_ref, w2t_ref, o_ref, pooled_acc):
        k = pl.program_id(1)

        @pl.when(k == 0)
        def _init():
            pooled_acc[0:B, :] = jnp.zeros((B, C), jnp.float32)
            pooled_acc[B:2 * B, :] = jnp.full((B, C), -jnp.inf, jnp.float32)

        x = x_ref[...]                                             # (B, C, hw_chunk)

        def _accum(x_sum_f32, x_max):
            pooled_acc[0:B, :] += jnp.sum(x_sum_f32, axis=-1)
            pooled_acc[B:2 * B, :] = jnp.maximum(
                pooled_acc[B:2 * B, :],
                jnp.max(x_max, axis=-1).astype(jnp.float32))

        if needs_mask:
            # Unmasked hot path for all full chunks.
            @pl.when(k < num_chunks - 1)
            def _full_chunk():
                _accum(x.astype(jnp.float32), x)

            # Mask (iota + selects) only on the final, partial chunk.
            @pl.when(k == num_chunks - 1)
            def _tail_chunk():
                xf = x.astype(jnp.float32)
                lane = jax.lax.broadcasted_iota(jnp.int32, xf.shape, 2)
                valid = (k * hw_chunk + lane) < HW
                _accum(jnp.where(valid, xf, 0.0),
                       jnp.where(valid, xf, -jnp.inf))
        else:
            _accum(x.astype(jnp.float32), x)

        @pl.when(k == num_chunks - 1)
        def _finalize():
            pooled_acc[0:B, :] = pooled_acc[0:B, :] * inv_hw       # sum -> mean
            pooled = pooled_acc[...]                               # (2B, C) f32
            h = jnp.maximum(
                jnp.dot(pooled, w1t_ref[...].astype(jnp.float32),
                        preferred_element_type=jnp.float32), 0.0)  # (2B, hidden)
            y = jnp.dot(h, w2t_ref[...].astype(jnp.float32),
                        preferred_element_type=jnp.float32)        # (2B, C)
            att = jax.nn.sigmoid(y[0:B] + y[B:2 * B])              # (B, C)
            o_ref[0] = att.astype(o_ref.dtype)

    return kernel


# --------------------------------------------------------------------------
# Wrapper
# --------------------------------------------------------------------------
def _tpu_vmem_capacity_bytes():
    try:
        cap = getattr(pltpu.get_tpu_info(), "vmem_capacity_bytes", None)
        if cap:
            return int(cap)
    except Exception:
        pass
    return 64 << 20   # conservative fallback (v7x-sized)


def channel_attention(x_nchw, w1, w2, *, max_tile_bytes=None):
    """CBAM channel attention.

    x_nchw: (N, C, H, W); w1: (C//r, C) fc1 weight; w2: (C, C//r) fc2 weight.
    Returns sigmoid(fc2(relu(fc1(avg))) + fc2(relu(fc1(max)))) as (N, C, 1, 1).

    max_tile_bytes (optional) caps the VMEM footprint budgeted for the x
    pipeline (DMA double-buffers + f32 temporaries); None -> derived from the
    TPU generation's VMEM capacity.
    """
    N, C, H, W = x_nchw.shape
    hidden = w1.shape[0]
    assert w1.shape == (hidden, C) and w2.shape == (C, hidden)
    HW = H * W

    # Keep x in its native dtype (HBM bandwidth): only flatten spatial dims.
    x_flat = x_nchw.reshape(N, C, HW)
    w1_t = jnp.swapaxes(w1, 0, 1)   # (C, hidden)
    w2_t = jnp.swapaxes(w2, 0, 1)   # (hidden, C)

    itemsize = jnp.dtype(x_flat.dtype).itemsize
    w_bytes = (w1_t.size * jnp.dtype(w1_t.dtype).itemsize
               + w2_t.size * jnp.dtype(w2_t.dtype).itemsize)

    # ---- Generation-aware VMEM budget --------------------------------------
    vmem_cap = _tpu_vmem_capacity_bytes()
    multi_core = vmem_cap < (100 << 20)            # v7x: 64 MiB / TC, 2 TCs
    num_tc = 2 if multi_core else 1
    if multi_core:
        hard_cap = 56 << 20
    else:
        hard_cap = max(min(100 << 20, vmem_cap - (16 << 20)), 32 << 20)

    headroom = 8 << 20
    # Double-buffered weights + double-buffered output tile + f32 scratch.
    fixed = (2 * w_bytes + 2 * N * C * itemsize
             + 2 * N * C * 4 + 2 * N * hidden * 4)
    avail = max(hard_cap - fixed - headroom, 1 << 20)
    # Per x element: 2 DMA buffers in native dtype + ~2 f32-sized temporaries.
    per_elem = 2 * itemsize + 8
    if max_tile_bytes is not None:
        max_tile_elems = max(int(max_tile_bytes) // per_elem, 1)
    else:
        max_tile_elems = avail // per_elem

    divisors_n = [d for d in range(1, N + 1) if N % d == 0]

    def _pick_batch(elems_per_batch_row):
        """Largest divisor of N whose tile fits; on multi-core parts prefer a
        group count that divides evenly across TensorCores."""
        fitting = [d for d in divisors_n
                   if d * elems_per_batch_row <= max_tile_elems] or [1]
        if multi_core:
            aligned = [d for d in fitting if (N // d) % num_tc == 0]
            if aligned:
                return max(aligned)
        return max(fitting)

    # Valid channel-chunk sizes: full C, or divisors of C that are multiples of 8.
    c_choices = sorted({C} | {d for d in range(8, C, 8) if C % d == 0})
    use_c_path = min(c_choices) * HW <= max_tile_elems

    if use_c_path:
        # ---- Primary path: chunk C, keep the full H*W row (no masking) -----
        c_chunk = max(d for d in c_choices if d * HW <= max_tile_elems)
        num_c_chunks = C // c_chunk
        B = _pick_batch(c_chunk * HW)
        num_groups = N // B
        grid = (num_groups, num_c_chunks)
        tile_elems = B * c_chunk * HW

        kernel = _make_channel_chunk_kernel(B, num_c_chunks, HW)
        in_specs = [
            pl.BlockSpec((B, c_chunk, HW), lambda i, c: (i, c, 0)),
            pl.BlockSpec((c_chunk, hidden), lambda i, c: (c, 0)),
            pl.BlockSpec((hidden, C), lambda i, c: (0, 0)),
        ]
        scratch = [pltpu.VMEM((2 * B, hidden), jnp.float32)]
    else:
        # ---- Fallback: chunk the flattened spatial axis (very large H*W) ---
        hw_chunk = max(512, (max(max_tile_elems // C, 1) // 128) * 128)
        if hw_chunk >= HW:
            hw_chunk = HW                      # full dim: always layout-legal
        num_chunks = -(-HW // hw_chunk)
        B = _pick_batch(C * hw_chunk)
        num_groups = N // B
        grid = (num_groups, num_chunks)
        tile_elems = B * C * hw_chunk

        kernel = _make_hw_chunk_kernel(B, C, HW, hw_chunk, num_chunks)
        in_specs = [
            pl.BlockSpec((B, C, hw_chunk), lambda i, k: (i, 0, k)),
            pl.BlockSpec((C, hidden), lambda i, k: (0, 0)),
            pl.BlockSpec((hidden, C), lambda i, k: (0, 0)),
        ]
        scratch = [pltpu.VMEM((2 * B, C), jnp.float32)]

    needed = tile_elems * per_elem + fixed
    vmem_limit = int(min(max(needed + headroom, 32 << 20),
                         max(hard_cap, 32 << 20)))

    out = pl.pallas_call(
        kernel,
        out_shape=jax.ShapeDtypeStruct((num_groups, B, C), x_flat.dtype),
        grid_spec=pltpu.PrefetchScalarGridSpec(
            num_scalar_prefetch=0,
            grid=grid,
            in_specs=in_specs,
            out_specs=pl.BlockSpec((1, B, C), lambda i, k: (i, 0, 0)),
            scratch_shapes=scratch,
        ),
        compiler_params=pltpu.CompilerParams(
            dimension_semantics=("parallel", "arbitrary"),
            vmem_limit_bytes=vmem_limit,
        ),
    )(x_flat, w1_t, w2_t)

    return out.reshape(N, C, 1, 1)


# --------------------------------------------------------------------------
# Reference & tests
# --------------------------------------------------------------------------
def _reference(x_nchw, w1, w2):
    xf = x_nchw.astype(jnp.float32)
    avg = jnp.mean(xf, axis=(2, 3))              # (N, C)
    mx = jnp.max(xf, axis=(2, 3))                # (N, C)
    w1f = w1.astype(jnp.float32)
    w2f = w2.astype(jnp.float32)

    def mlp(p):
        return jnp.maximum(p @ w1f.T, 0.0) @ w2f.T

    out = jax.nn.sigmoid(mlp(avg) + mlp(mx))
    return out[:, :, None, None].astype(x_nchw.dtype)


if __name__ == "__main__":
    # Shapes consistent with the module: N=2, C=64 (ratio=8 -> hidden=8), 16x16.
    N, C, H, W = 2, 64, 16, 16
    ratio = 8
    hidden = C // ratio

    key = jax.random.PRNGKey(0)
    kx, k1, k2, kx2, kx3 = jax.random.split(key, 5)
    x = jax.random.normal(kx, (N, C, H, W), dtype=jnp.float32)
    # Conv2d(C, C//r, 1, bias=False) weight -> (C//r, C, 1, 1); squeeze the 1x1.
    w1 = jax.random.normal(k1, (hidden, C), dtype=jnp.float32) * 0.1
    # Conv2d(C//r, C, 1, bias=False) weight -> (C, C//r, 1, 1); squeeze the 1x1.
    w2 = jax.random.normal(k2, (C, hidden), dtype=jnp.float32) * 0.1

    # 1) Default auto-tiled path (full-C, full-HW blocks).
    out = jax.block_until_ready(channel_attention(x, w1, w2))
    ref = _reference(x, w1, w2)
    assert out.shape == (N, C, 1, 1)
    assert jnp.allclose(out, ref, atol=1e-5, rtol=1e-5), "mismatch (default path)"

    # 2) Force the channel-chunked path (c_chunk < C).
    out2 = jax.block_until_ready(
        channel_attention(x, w1, w2, max_tile_bytes=200 * 1024))
    assert jnp.allclose(out2, ref, atol=1e-5, rtol=1e-5), "mismatch (C-chunk path)"

    # 3) Force the HW-chunk fallback with a masked partial tail (HW=37*37=1369).
    x3 = jax.random.normal(kx3, (N, C, 37, 37), dtype=jnp.float32)
    out3 = jax.block_until_ready(
        channel_attention(x3, w1, w2, max_tile_bytes=64 * 1024))
    ref3 = _reference(x3, w1, w2)
    assert jnp.allclose(out3, ref3, atol=1e-5, rtol=1e-5), "mismatch (HW-chunk path)"

    # 4) bf16 input exercises the native-dtype DMA / native-dtype max path.
    xb = jax.random.normal(kx2, (N, C, 14, 14), dtype=jnp.bfloat16)
    outb = jax.block_until_ready(channel_attention(xb, w1, w2))
    refb = _reference(xb, w1, w2)
    assert jnp.allclose(outb.astype(jnp.float32), refb.astype(jnp.float32),
                        atol=2e-2, rtol=2e-2), "mismatch (bf16 path)"

    print("KERNEL_OK")
</pallas_src>

<mosaic_0001>
module attributes {stable_mosaic.version = 11 : i64} {
  func.func @kernel(%arg0: i32, %arg1: i32, %arg2: memref<1x64x256xf32, #tpu.memory_space<vmem>>, %arg3: memref<64x8xf32, #tpu.memory_space<vmem>>, %arg4: memref<8x64xf32, #tpu.memory_space<vmem>>, %arg5: memref<1x1x64xf32, #tpu.memory_space<vmem>>, %arg6: memref<2x8xf32, #tpu.memory_space<vmem>>) attributes {dimension_semantics = [#tpu.dimension_semantics<parallel>, #tpu.dimension_semantics<arbitrary>], iteration_bounds = array<i64: 2, 1>, scalar_prefetch = 0 : i64, scratch_operands = 1 : i64, tpu.core_type = #tpu.core_type<tc>, window_params = [{transform_indices = @transform_0, window_bounds = array<i64: 1, 64, 256>}, {transform_indices = @transform_1, window_bounds = array<i64: 64, 8>}, {pipeline_mode = #tpu.pipeline_mode<synchronous>, transform_indices = @transform_2, window_bounds = array<i64: 8, 64>}, {transform_indices = @transform_3, window_bounds = array<i64: 1, 1, 64>}]} {
    %c0_i32 = arith.constant 0 : i32
    %0 = arith.cmpi eq, %arg1, %c0_i32 : i32
    %1 = arith.extui %0 : i1 to i32
    %c0_i32_0 = arith.constant 0 : i32
    %2 = arith.cmpi ne, %1, %c0_i32_0 : i32
    scf.if %2 {
      %cst_18 = arith.constant 0.000000e+00 : f32
      %20 = vector.broadcast %cst_18 : f32 to vector<2x8xf32>
      %c0_19 = arith.constant 0 : index
      %c0_20 = arith.constant 0 : index
      %21 = vector.load %arg6[%c0_19, %c0_20] : memref<2x8xf32, #tpu.memory_space<vmem>>, vector<2x8xf32>
      tpu.vector_store %arg6[%c0_19, %c0_20], %20 {strides = array<i32>} : memref<2x8xf32, #tpu.memory_space<vmem>>, vector<2x8xf32>,
    } else {
    }
    %c0 = arith.constant 0 : index
    %c0_1 = arith.constant 0 : index
    %c0_2 = arith.constant 0 : index
    %3 = vector.load %arg2[%c0, %c0_1, %c0_2] : memref<1x64x256xf32, #tpu.memory_space<vmem>>, vector<1x64x256xf32>
    %cst = arith.constant dense<0.000000e+00> : vector<1x64xf32>
    %4 = vector.multi_reduction <add>, %3, %cst [2] : vector<1x64x256xf32> to vector<1x64xf32>
    %cst_3 = arith.constant 3.906250e-03 : f32
    %5 = vector.broadcast %cst_3 : f32 to vector<1x64xf32>
    %6 = arith.mulf %4, %5 : vector<1x64xf32>
    %cst_4 = arith.constant dense<0xFF800000> : vector<1x64xf32>
    %7 = vector.multi_reduction <maximumf>, %3, %cst_4 [2] : vector<1x64x256xf32> to vector<1x64xf32>
    %c0_5 = arith.constant 0 : index
    %c0_6 = arith.constant 0 : index
    %8 = vector.load %arg3[%c0_5, %c0_6] : memref<64x8xf32, #tpu.memory_space<vmem>>, vector<64x8xf32>
    %c0_7 = arith.constant 0 : index
    %c0_8 = arith.constant 0 : index
    %9 = vector.load %arg6[%c0_7, %c0_8] : memref<2x8xf32, #tpu.memory_space<vmem>>, vector<1x8xf32>
    %cst_9 = arith.constant dense<0.000000e+00> : vector<1x8xf32>
    %10 = tpu.matmul %6, %8, %cst_9 {dimension_numbers = #tpu.dot_dimension_numbers<[1], [0], [0], [1], [0, 0, 1, 1], [], []>} : vector<1x64xf32>, vector<64x8xf32>, vector<1x8xf32> -> vector<1x8xf32>
    %11 = arith.addf %9, %10 : vector<1x8xf32>
    %c0_10 = arith.constant 0 : index
    %c0_11 = arith.constant 0 : index
    %12 = vector.load %arg6[%c0_10, %c0_11] : memref<2x8xf32, #tpu.memory_space<vmem>>, vector<1x8xf32>
    tpu.vector_store %arg6[%c0_10, %c0_11], %11 {strides = array<i32>} : memref<2x8xf32, #tpu.memory_space<vmem>>, vector<1x8xf32>,
    %c1 = arith.constant 1 : index
    %c0_12 = arith.constant 0 : index
    %13 = vector.load %arg6[%c1, %c0_12] : memref<2x8xf32, #tpu.memory_space<vmem>>, vector<1x8xf32>
    %cst_13 = arith.constant dense<0.000000e+00> : vector<1x8xf32>
    %14 = tpu.matmul %7, %8, %cst_13 {dimension_numbers = #tpu.dot_dimension_numbers<[1], [0], [0], [1], [0, 0, 1, 1], [], []>} : vector<1x64xf32>, vector<64x8xf32>, vector<1x8xf32> -> vector<1x8xf32>
    %15 = arith.addf %13, %14 : vector<1x8xf32>
    %c1_14 = arith.constant 1 : index
    %c0_15 = arith.constant 0 : index
    %16 = vector.load %arg6[%c1_14, %c0_15] : memref<2x8xf32, #tpu.memory_space<vmem>>, vector<1x8xf32>
    tpu.vector_store %arg6[%c1_14, %c0_15], %15 {strides = array<i32>} : memref<2x8xf32, #tpu.memory_space<vmem>>, vector<1x8xf32>,
    %c0_i32_16 = arith.constant 0 : i32
    %17 = arith.cmpi eq, %arg1, %c0_i32_16 : i32
    %18 = arith.extui %17 : i1 to i32
    %c0_i32_17 = arith.constant 0 : i32
    %19 = arith.cmpi ne, %18, %c0_i32_17 : i32
    scf.if %19 {
      %c0_18 = arith.constant 0 : index
      %c0_19 = arith.constant 0 : index
      %20 = vector.load %arg6[%c0_18, %c0_19] : memref<2x8xf32, #tpu.memory_space<vmem>>, vector<2x8xf32>
      %cst_20 = arith.constant 0.000000e+00 : f32
      %21 = vector.broadcast %cst_20 : f32 to vector<2x8xf32>
      %22 = arith.maximumf %20, %21 : vector<2x8xf32>
      %c0_21 = arith.constant 0 : index
      %c0_22 = arith.constant 0 : index
      %23 = vector.load %arg4[%c0_21, %c0_22] : memref<8x64xf32, #tpu.memory_space<vmem>>, vector<8x64xf32>
      %cst_23 = arith.constant dense<0.000000e+00> : vector<2x64xf32>
      %24 = tpu.matmul %22, %23, %cst_23 {dimension_numbers = #tpu.dot_dimension_numbers<[1], [0], [0], [1], [0, 0, 1, 1], [], []>} : vector<2x8xf32>, vector<8x64xf32>, vector<2x64xf32> -> vector<2x64xf32>
      %25 = vector.extract_strided_slice %24 {offsets = [0, 0], sizes = [1, 64], strides = [1, 1]} : vector<2x64xf32> to vector<1x64xf32>
      %26 = vector.extract_strided_slice %24 {offsets = [1, 0], sizes = [1, 64], strides = [1, 1]} : vector<2x64xf32> to vector<1x64xf32>
      %27 = arith.addf %25, %26 : vector<1x64xf32>
      %28 = arith.negf %27 : vector<1x64xf32>
      %29 = math.exp %28 : vector<1x64xf32>
      %cst_24 = arith.constant 1.000000e+00 : f32
      %30 = vector.broadcast %cst_24 : f32 to vector<1x64xf32>
      %31 = arith.addf %30, %29 : vector<1x64xf32>
      %32 = arith.divf %30, %31 : vector<1x64xf32>
      %c0_25 = arith.constant 0 : index
      %c0_26 = arith.constant 0 : index
      %c0_27 = arith.constant 0 : index
      %33 = vector.load %arg5[%c0_25, %c0_26, %c0_27] : memref<1x1x64xf32, #tpu.memory_space<vmem>>, vector<1x1x64xf32>
      %34 = vector.shape_cast %33 : vector<1x1x64xf32> to vector<1x64xf32>
      %35 = vector.shape_cast %32 : vector<1x64xf32> to vector<1x1x64xf32>
      tpu.vector_store %arg5[%c0_25, %c0_26, %c0_27], %35 {strides = array<i32>} : memref<1x1x64xf32, #tpu.memory_space<vmem>>, vector<1x1x64xf32>,
    } else {
    }
    return
  }
  func.func @transform_0(%arg0: i32, %arg1: i32) -> (i32, i32, i32) {
    %c0_i32 = arith.constant 0 : i32
    %c0_i32_0 = arith.constant 0 : i32
    return %arg0, %arg1, %c0_i32 : i32, i32, i32
  }
  func.func @transform_1(%arg0: i32, %arg1: i32) -> (i32, i32) {
    %c0_i32 = arith.constant 0 : i32
    %c0_i32_0 = arith.constant 0 : i32
    return %arg1, %c0_i32 : i32, i32
  }
  func.func @transform_2(%arg0: i32, %arg1: i32) -> (i32, i32) {
    %c0_i32 = arith.constant 0 : i32
    %c0_i32_0 = arith.constant 0 : i32
    %c0_i32_1 = arith.constant 0 : i32
    return %c0_i32, %c0_i32_0 : i32, i32
  }
  func.func @transform_3(%arg0: i32, %arg1: i32) -> (i32, i32, i32) {
    %c0_i32 = arith.constant 0 : i32
    %c0_i32_0 = arith.constant 0 : i32
    %c0_i32_1 = arith.constant 0 : i32
    return %arg0, %c0_i32, %c0_i32_0 : i32, i32, i32
  }
}

</mosaic_0001>

<bundles_post_ra>
// kernel: tpu_custom_call.1
= control target key start
LH: loop header
LB: loop body
LE: loop exit
PB: predicated region body
PF: predicated region fallthrough
CT: control target
= control target key end

     0   :  { %8 = vsyncpa [#allocation4], 0  ;;  %s998_s0 = inlined_call_operand.hbm [shape: f32[2,64,256], index: 0, kind: input, shape index: {}]   ;;  %s999_s1 = inlined_call_operand.vmem [shape: f32[64,8], index: 1, kind: input, shape index: {}]   ;;  %s1000_s2 = inlined_call_operand.vmem [shape: f32[8,64], index: 2, kind: input, shape index: {}]   ;;  %s1001_s3 = inlined_call_operand.hbm [shape: f32[2,1,64], index: 3, kind: output, shape index: {}]  }
   0x1   :  { %10 = vsyncpa [#allocation4 + $0x1], 0 }
   0x2   :  { %11 = vsyncpa [#allocation5], 0 }
   0x3   :  { %13 = vsyncpa [#allocation5 + $0x1], 0  ;;  %s813_s12 = smov 0   ;;  %s815_s13 = smov 0  }
   0x4   :  { %s817_s14 = smov 0   ;;  %s819_s15 = smov 0  }
   0x5   :  { %s821_s16 = smov 0   ;;  %s823_s17 = smov 0  }
   0x6 LB: > { %s590_s18 = sadd.s32 4294967295, %s788_s17   ;;  %s591_s19 = sadd.s32 4294967294, %s788_s17   ;;  %s788_s17 = sphi %s823_s17, %s19_s17   ;;  %s784_s16 = sphi %s821_s16, %s1010_s16   ;;  %s780_s15 = sphi %s819_s15, %s1009_s15   ;;  %s776_s14 = sphi %s817_s14, %s1008_s14   ;;  %s772_s13 = sphi %s815_s13, %s1007_s13   ;;  %s768_s12 = sphi %s813_s12, %s1006_s12  }
   0x7   : > { %s31_s20 = sadd.s32 1, %s784_s16  ;;  %s40_s21 = sadd.s32 1, %s776_s14 }
   0x8   : > { %p33_p0 = scmp.ge.s32.totalorder %s31_s20, 2  ;;  %p47_p1 = scmp.ne.s32.totalorder %s776_s14, %s772_s13 }
   0x9   : > { %p48_p2 = scmp.eq.s32.totalorder %s788_s17, 0  ;;  %p53_p3 = scmp.ne.s32.totalorder %s772_s13, %s768_s12 }
   0xa   : > { %s1012_s20 = smov (%p33_p0, %s31_s20), 0  ;;  %p54_p5 = scmp.eq.s32.totalorder %s590_s18, 0 }
   0xb   : > { %p854_p4 = por %p48_p2, %p47_p1  ;;  %s35_s23 = ssub.s32 %s784_s16, %s1012_s20 }
   0xc   : > { %p124_p6 = scmp.eq.s32.totalorder %s590_s18, 1  ;;  %p38_p7 = scmp.eq.s32.totalorder %s35_s23, 0 }
   0xd   : > { %p860_p8 = por %p54_p5, %p53_p3  ;;  %p130_p10 = scmp.eq.s32.totalorder %s591_s19, 1 }
   0xe   : > { %p864_p9 = por %p124_p6, %p47_p1  ;;  %p594_p12 = scmp.ge.s32.totalorder %s788_s17, 2 }
   0xf   : > { %s869_s26 = scalar_select %p38_p7, %s776_s14, %s40_s21  }
  0x10   : > { %p871_p11 = por %p130_p10, %p53_p3  ;;  %p619_p13 = scmp.lt.s32.totalorder %s788_s17, 2 }
  0x11   : > { %s162_s28 = sand.u32 1, %s776_s14   ;;  %s606_s30 = sshll.u32 %s784_s16, 7 }
  0x12   : > { %s595_s29 = sshll.u32 %s162_s28, 7  ;;  %s174_s6 = scalar_lea.hbm %s998_s0, %s606_s30 }
  0x13   : > { %s166_s7 = scalar_lea.vmem [#allocation3], %s595_s29  ;;  %s175_s9 = sshll.u32 %s174_s6, 4  ;;  %s176_s9 = int_to_ptr.hbm [resolvable:$true] %s175_s9 }
  0x14   : > { %s177_s8 = sshll.u32 %s166_s7, 4  ;;  %p612_p0 = pnand %p619_p13, %p854_p4  ;;  %s178_s8 = int_to_ptr.vmem [resolvable:$true] %s177_s8 }
  0x15   : > { %p598_p1 = scmp.ge.s32.totalorder %s788_s17, 1  ;;  %s163_s10 = scalar_lea.sflag [#allocation4], %s162_s28 }
  0x16   : > { %s790_s11 = smov 256   ;;  %s791_s18 = smov 16  }
  0x17   : > { %614 = dma.hbm_to_vmem [thread:$0]  (!%p612_p0), %s176_s9, 2048, %s178_s8, %s163_s10, %s790_s11, %s790_s11, %s791_s18  }
  0x18   : > { %p185_p2 = scmp.lt.s32.totalorder %s788_s17, 3 }
  0x1a   : > { %p186_p3 = pnand %p598_p1, %p185_p2 }
  0x1b   : > { %s887_s19 = sand.u32 (!%p186_p3), 1, %s772_s13  }
  0x1c   : > { %189 = sbr.rel (%p186_p3) target bundleno = 502 (0x1f6), region = 32  ;;  %s599_s21 = sshll.u32 (!%p186_p3), %s887_s19, 7 }
  0x1d   : > { %s192_s23 = scalar_lea.sflag (!%p186_p3), [#allocation4], %s887_s19  ;;  %s891_s29 = scalar_lea.vmem (!%p186_p3), [#allocation3], %s599_s21 }
  0x21   : > { %759 = dma.done.wait (%p860_p8), %s192_s23, 2048  }
  0x22   : > { %761 = vsyncadd (%p860_p8), %s192_s23, 4294965248  ;;  %v240_v0 = vld [vmem:[%s891_s29 + $0x20] sm:$0xff]  ;;  %v241_v1 = vld [vmem:[%s891_s29 + $0x28] sm:$0xff]  ;;  %vm234_vm0 = vcmask 58368   ;;  %v325_v46 = vlaneseq  ;;  %v792_v47 = vmov 0.0   ;;  %vm330_vm1 = vcmask 130112   ;;  %s494_s4 = scalar_lea.hbm %s1001_s3, %s780_s15 }
  0x23   : > { %v236_v2 = vld [vmem:[%s891_s29] sm:$0xff]  ;;  %v258_v3 = vadd.f32 %v241_v1, %v240_v0  ;;  %v237_v4 = vld [vmem:[%s891_s29 + $0x8] sm:$0xff]  ;;  %v242_v7 = vld [vmem:[%s891_s29 + $0x30] sm:$0xff]  ;;  %v290_v18 = vmax.f32 %v240_v0, %v241_v1  ;;  %235 = vst.msk [vmem:[#allocation2] sm:$0x3] %vm234_vm0, %v792_v47  ;;  %vm334_vm2 = vcmask 195712  }
  0x24   : > { %v284_v5 = vmax.f32 %v236_v2, %v237_v4  ;;  %v252_v6 = vadd.f32 %v237_v4, %v236_v2  ;;  %v243_v8 = vld [vmem:[%s891_s29 + $0x38] sm:$0xff]  ;;  %v238_v9 = vld [vmem:[%s891_s29 + $0x10] sm:$0xff]  ;;  %v244_v14 = vld [vmem:[%s891_s29 + $0x40] sm:$0xff]  ;;  %v326_v51 = vand.u32 127, %v325_v46  ;;  %vm338_vm3 = vcmask 261312   ;;  %s222_s5 = scalar_lea.vmem [#allocation6], %s887_s19 }
  0x25   : > { %259 = vadd.xlane.f32.xlu1 %v258_v3  ;;  %v239_v10 = vld [vmem:[%s891_s29 + $0x18] sm:$0xff]  ;;  %v261_v11 = vadd.f32 %v243_v8, %v242_v7  ;;  %v245_v15 = vld [vmem:[%s891_s29 + $0x48] sm:$0xff]  ;;  %v246_v16 = vld [vmem:[%s891_s29 + $0x50] sm:$0xff]  ;;  %v293_v24 = vmax.f32 %v242_v7, %v243_v8  ;;  %vm342_vm4 = vcmask 326912   ;;  %vm346_vm5 = vcmask 392512   ;;  %s496_s6 = sshll.u32 %s222_s5, 4  ;;  %s497_s6 = int_to_ptr.vmem [resolvable:$true] %s496_s6 }
  0x26   : > { %285 = vmax.xlane.f32.xlu2 %v284_v5  ;;  %253 = vadd.xlane.f32.xlu0 %v252_v6  ;;  %v287_v12 = vmax.f32 %v238_v9, %v239_v10  ;;  %v255_v13 = vadd.f32 %v239_v10, %v238_v9  ;;  %v247_v17 = vld [vmem:[%s891_s29 + $0x58] sm:$0xff]  ;;  %v264_v19 = vadd.f32 %v245_v15, %v244_v14  ;;  %v248_v21 = vld [vmem:[%s891_s29 + $0x60] sm:$0xff]  ;;  %v249_v22 = vld [vmem:[%s891_s29 + $0x68] sm:$0xff]  ;;  %v328_v54 = vadd.s32 4294967288, %v326_v51  ;;  %s498_s7 = sshll.u32 %s494_s4, 4  ;;  %s486_s15 = scalar_lea.sflag [#allocation5], %s887_s19  ;;  %s499_s7 = int_to_ptr.hbm [resolvable:$true] %s498_s7 }
  0x27   : > { %v267_v20 = vadd.f32 %v247_v17, %v246_v16  ;;  %v270_v23 = vadd.f32 %v249_v22, %v248_v21  ;;  %v296_v25 = vmax.f32 %v244_v14, %v245_v15  ;;  %v250_v26 = vld [vmem:[%s891_s29 + $0x70] sm:$0xff]  ;;  %v251_v27 = vld [vmem:[%s891_s29 + $0x78] sm:$0xff]  ;;  %v299_v28 = vmax.f32 %v246_v16, %v247_v17  ;;  %v313_v34 = vld [vmem:[%s999_s1 + $0x28] sm:$0xff]  ;;  %s720_s8 = sshra.s32 %s499_s7, 4  ;;  %s726_s18 = scalar_lea.hbm %s1001_s3, 2  ;;  %s721_s8 = int_to_ptr.hbm [resolvable:$true] %s720_s8 }
  0x28   : > { %v273_v29 = vadd.f32 %v251_v27, %v250_v26  ;;  %v302_v30 = vmax.f32 %v248_v21, %v249_v22  ;;  %v305_v31 = vmax.f32 %v250_v26, %v251_v27  ;;  %v315_v32 = vld [vmem:[%s999_s1 + $0x38] sm:$0xff]  ;;  %v314_v33 = vld [vmem:[%s999_s1 + $0x30] sm:$0xff]  ;;  %v312_v35 = vld [vmem:[%s999_s1 + $0x20] sm:$0xff]  ;;  %v332_v56 = vadd.s32 4294967280, %v326_v51  ;;  %s722_s9 = scalar_lea.hbm %s721_s8, 1  ;;  %p727_p7 = scmp.lt.s32.totalorder %s721_s8, %s1001_s3 }
  0x29   : > { %367 = vmatpush.msra.mxu0 %v315_v32  ;;  %416 = vmatpush.msra.mxu1 %v315_v32  ;;  %v311_v36 = vld [vmem:[%s999_s1 + $0x18] sm:$0xff]  ;;  %v310_v40 = vld [vmem:[%s999_s1 + $0x10] sm:$0xff]  ;;  %v309_v41 = vld [vmem:[%s999_s1 + $0x8] sm:$0xff]  ;;  %v336_v59 = vadd.s32 4294967272, %v326_v51  ;;  %v340_v62 = vadd.s32 4294967264, %v326_v51  ;;  %v344_v5 = vadd.s32 4294967256, %v326_v51  ;;  %p723_p4 = scmp.ne.s32.totalorder %s721_s8, %s722_s9  ;;  %p728_p8 = scmp.lt.s32.totalorder %s726_s18, %s722_s9 }
  0x2a   : > { %v308_v42 = vld [vmem:[%s999_s1] sm:$0xff]  ;;  %v348_v9 = vadd.s32 4294967248, %v326_v51  ;;  %v352_v17 = vadd.s32 4294967240, %v326_v51  ;;  %vm350_vm6 = vcmask 458112   ;;  %vm354_vm7 = vcmask 523712  }
  0x2b   : > { %368 = vmatpush.msra.mxu0 %v314_v33  ;;  %417 = vmatpush.msra.mxu1 %v314_v33  ;;  %vm356_vm8 = vcmask 523264   ;;  %vm380_vm9 = vcmask 57344   ;;  %vm436_vm10 = vcmask 64512   ;;  %vm483_vm14 = vcmask 516096   ;;  %p724_p5 = pnand %p723_p4, %p864_p9  ;;  %p729_p10 = por %p728_p8, %p727_p7 }
  0x2d   : > { %262 = vadd.xlane.f32.xlu1 %v261_v11  ;;  %369 = vmatpush.msra.mxu0 %v313_v34  ;;  %p725_p6 = pneg %p724_p5 }
  0x2e   : > { %288 = vmax.xlane.f32.xlu2 %v287_v12  ;;  %256 = vadd.xlane.f32.xlu0 %v255_v13 }
  0x2f   : > { %418 = vmatpush.msra.mxu1 %v313_v34  ;;  %370 = vmatpush.msra.mxu0 %v312_v35  ;;  %p730_p13 = pnand %p729_p10, %p725_p6 }
  0x31   : > { %419 = vmatpush.msra.mxu1 %v312_v35  ;;  %371 = vmatpush.msra.mxu0 %v311_v36 }
  0x33   : > { %420 = vmatpush.msra.mxu1 %v311_v36  ;;  %372 = vmatpush.msra.mxu0 %v310_v40 }
  0x35   : > { %291 = vmax.xlane.f32.xlu1 %v290_v18  ;;  %421 = vmatpush.msra.mxu1 %v310_v40  ;;  %v435_v40 = vld [vmem:[%s1000_s2] sm:$0xff] }
  0x36   : > { %265 = vadd.xlane.f32.xlu0 %v264_v19  ;;  %268 = vadd.xlane.f32.xlu2 %v267_v20 }
  0x37   : > { %373 = vmatpush.msra.mxu0 %v309_v41  ;;  %422 = vmatpush.msra.mxu1 %v309_v41  ;;  %v316_v41 = vld [vmem:[#allocation2] sm:$0x1] }
  0x38   : > { %455 = vmatpush.msra.mxu2 %v435_v40 }
  0x39   : > { %374 = vmatpush.msra.mxu0 %v308_v42  ;;  %423 = vmatpush.msra.mxu1 %v308_v42 }
  0x3d   : > { %271 = vadd.xlane.f32.xlu1 %v270_v23 }
  0x3e   : > { %294 = vmax.xlane.f32.xlu0 %v293_v24  ;;  %297 = vmax.xlane.f32.xlu2 %v296_v25 }
  0x45   : > { %300 = vmax.xlane.f32.xlu1 %v299_v28 }
  0x46   : > { %274 = vadd.xlane.f32.xlu0 %v273_v29  ;;  %303 = vmax.xlane.f32.xlu2 %v302_v30 }
  0x4e   : > { %306 = vmax.xlane.f32.xlu0 %v305_v31 }
  0x98   : > { %v260_v37 = vpop.xlane.xlu1 %259 }
  0x99   : > { %v928_v38 = vpop.xlane.xlu2 %285  ;;  %v254_v39 = vpop.xlane.xlu0 %253  ;;  %v278_v57 = vmul.f32 0.00390625, %v260_v37 }
  0x9a   : > { %v276_v53 = vmul.f32 0.00390625, %v254_v39  ;;  %v391_v11 = vperm.slane %v928_v38, %v326_v51 }
  0x9b   : > { %v333_v3 = vperm.slane %v278_v57, %v332_v56 }
  0x9c   : > { %v327_v58 = vperm.slane %v276_v53, %v326_v51 }
  0xa0   : > { %v263_v43 = vpop.xlane.xlu1 %262 }
  0xa1   : > { %v289_v44 = vpop.xlane.xlu2 %288  ;;  %v257_v45 = vpop.xlane.xlu0 %256  ;;  %v279_v60 = vmul.f32 0.00390625, %v263_v43 }
  0xa2   : > { %v277_v52 = vmul.f32 0.00390625, %v257_v45  ;;  %v392_v12 = vperm.slane %v289_v44, %v328_v54  ;;  %v382_v44 = vld [vmem:[#allocation2 + $0x1] sm:$0x1] }
  0xa3   : > { %v337_v4 = vperm.slane %v279_v60, %v336_v59 }
  0xa4   : > { %v329_v55 = vperm.slane %v277_v52, %v328_v54  ;;  %v393_v22 = vsel %vm330_vm1, %v392_v12, %v391_v11 }
  0xa6   : > { %v331_v1 = vsel %vm330_vm1, %v329_v55, %v327_v58 }
  0xa7   : > { %v335_v7 = vsel %vm334_vm2, %v333_v3, %v331_v1 }
  0xa8   : > { %v292_v48 = vpop.xlane.xlu1 %291  ;;  %v339_v14 = vsel %vm338_vm3, %v337_v4, %v335_v7 }
  0xa9   : > { %v266_v49 = vpop.xlane.xlu0 %265  ;;  %v269_v50 = vpop.xlane.xlu2 %268  ;;  %v394_v13 = vperm.slane %v292_v48, %v332_v56 }
  0xaa   : > { %v280_v63 = vmul.f32 0.00390625, %v266_v49  ;;  %v281_v6 = vmul.f32 0.00390625, %v269_v50 }
  0xab   : > { %v395_v24 = vsel %vm334_vm2, %v394_v13, %v393_v22 }
  0xac   : > { %v341_v8 = vperm.slane %v280_v63, %v340_v62  ;;  %v345_v15 = vperm.slane %v281_v6, %v344_v5 }
  0xae   : > { %v343_v18 = vsel %vm342_vm4, %v341_v8, %v339_v14 }
  0xaf   : > { %v347_v30 = vsel %vm346_vm5, %v345_v15, %v343_v18 }
  0xb0   : > { %v272_v61 = vpop.xlane.xlu1 %271 }
  0xb1   : > { %v295_v0 = vpop.xlane.xlu0 %294  ;;  %v298_v2 = vpop.xlane.xlu2 %297  ;;  %v282_v10 = vmul.f32 0.00390625, %v272_v61 }
  0xb2   : > { %v396_v16 = vperm.slane %v295_v0, %v336_v59  ;;  %v398_v25 = vperm.slane %v298_v2, %v340_v62 }
  0xb3   : > { %v349_v19 = vperm.slane %v282_v10, %v348_v9 }
  0xb4   : > { %v397_v26 = vsel %vm338_vm3, %v396_v16, %v395_v24 }
  0xb5   : > { %v351_v31 = vsel %vm350_vm6, %v349_v19, %v347_v30  ;;  %v399_v33 = vsel %vm342_vm4, %v398_v25, %v397_v26 }
  0xb8   : > { %v301_v20 = vpop.xlane.xlu1 %300 }
  0xb9   : > { %v275_v21 = vpop.xlane.xlu0 %274  ;;  %v400_v27 = vperm.slane %v301_v20, %v344_v5  ;;  %v304_v29 = vpop.xlane.xlu2 %303 }
  0xba   : > { %v283_v23 = vmul.f32 0.00390625, %v275_v21  ;;  %v402_v34 = vperm.slane %v304_v29, %v348_v9 }
  0xbb   : > { %v401_v35 = vsel %vm346_vm5, %v400_v27, %v399_v33 }
  0xbc   : > { %v353_v28 = vperm.slane %v283_v23, %v352_v17  ;;  %v403_v38 = vsel %vm350_vm6, %v402_v34, %v401_v35 }
  0xbe   : > { %v355_v32 = vsel %vm354_vm7, %v353_v28, %v351_v31 }
  0xbf   : > { %600 = vmatmul.msk.f32.vlgmr.msra.gmra.mxu0 %vm356_vm8, %v355_v32 }
  0xc1   : > { %v307_v36 = vpop.xlane.xlu0 %306 }
  0xc2   : > { %v404_v37 = vperm.slane %v307_v36, %v352_v17 }
  0xc4   : > { %v405_v39 = vsel %vm354_vm7, %v404_v37, %v403_v38 }
  0xc5   : > { %601 = vmatmul.msk.f32.vlgmr.msra.gmra.mxu1 %vm356_vm8, %v405_v39 }
 0x13c   : > { %v376_v42 = vpop.f32.mrf.mxu0 }
 0x13d   : > { %v379_v43 = vadd.f32 %v376_v42, %v316_v41 }
 0x13f   : > { %381 = vst.msk [vmem:[#allocation2] sm:$0x1] %vm380_vm9, %v379_v43 }
 0x142   : > { %v425_v45 = vpop.f32.mrf.mxu1 }
 0x143   : > { %v428_v46 = vadd.f32 %v425_v45, %v382_v44 }
 0x145   : > { %429 = vst.msk [vmem:[#allocation2 + $0x1] sm:$0x1] %vm380_vm9, %v428_v46 }
 0x14c   : > { %v433_v47 = vld [vmem:[#allocation2] sm:$0x3] }
 0x14d   : > { %v434_v48 = vmax.f32 %v433_v47, 0.0 }
 0x14f   : > { %602 = vmatmul.msk.f32.vlgmr.msra.gmra.mxu2 %vm436_vm10, %v434_v48 }
 0x1d2   : > { %v457_v49 = vpop.f32.mrf.mxu2 }
 0x1d3   : > { %v461_v50 = vrot.slane %v457_v49, 1 }
 0x1d5   : > { %v463_v51 = vadd.f32 %v461_v50, %v457_v49 }
 0x1d7   : > { %v603_v52 = vmul.f32 -1.442695, %v463_v51 }
 0x1d9   : > { %672 = vpow2.f32 %v603_v52 }
 0x1df   : > { %v673_v53 = vpop.eup %672 }
 0x1e0   : > { %v467_v54 = vadd.f32 1.0, %v673_v53 }
 0x1e2   : > { %674 = vrcp.f32 %v467_v54  ;;  %v479_v58 = vand.u32 2147483648, %v467_v54  ;;  %v477_v60 = vand.u32 2147483647, %v467_v54  ;;  %vm473_vm12 = vweird.f32 %v467_v54 }
 0x1e4   : > { %v480_v62 = vor.u32 1.1754944e-38, %v479_v58  ;;  %vm478_vm15 = vcmp.eq.f32.partialorder %v477_v60, 8.507059e+37 }
 0x1e8   : > { %v675_v55 = vpop.eup %674 }
 0x1e9   : > { %v469_v56 = vmul.f32 %v675_v55, %v467_v54  ;;  %vm474_vm11 = vweird.f32 %v675_v55 }
 0x1ea   : > { %vm475_vm13 = vmor %vm473_vm12, %vm474_vm11 }
 0x1eb   : > { %v470_v57 = vsub.f32 1.0, %v469_v56 }
 0x1ed   : > { %v471_v59 = vmul.f32 %v675_v55, %v470_v57 }
 0x1ef   : > { %v472_v61 = vadd.f32 %v675_v55, %v471_v59 }
 0x1f1   : > { %v476_v63 = vsel %vm475_vm13, %v675_v55, %v472_v61 }
 0x1f2   : > { %v481_v0 = vsel %vm478_vm15, %v480_v62, %v476_v63 }
 0x1f3   : > { %484 = vst.msk [vmem:[%s222_s5] sm:$0x1] %vm483_vm14, %v481_v0 }
 0x1f4   : > { %733 = shalt.err (!%p730_p13)
}
 0x1f5   : > { %609 = dma.vmem_to_hbm [thread:$0]  (%p864_p9), %s497_s6, 16, %s499_s7, %s486_s15  }
 0x1f6 PF: > { %s510_s19 = sand.u32 1, %s768_s12   ;;  %p616_p0 = pnand %p594_p12, %p871_p11 }
 0x1f7   : > { %s511_s29 = scalar_lea.sflag [#allocation5], %s510_s19 }
 0x1f8   : > { %p617_p1 = pneg %p616_p0 }
 0x1fa   : > { %763 = dma.done.wait (%p617_p1), %s511_s29, 16  }
 0x1fb   : > { %765 = vsyncadd (%p617_p1), %s511_s29, 4294967280  ;;  %s19_s17 = sadd.s32 1, %s788_s17   ;;  %s1006_s12 = smov %s772_s13 }
 0x1fc   : > { %p16_p2 = scmp.ge.s32.totalorder %s19_s17, 4   ;;  %s1007_s13 = smov %s776_s14 }
 0x1fd   : > { %s1008_s14 = smov %s869_s26  ;;  %s1009_s15 = smov %s784_s16 }
 0x1fe   : > { %s1010_s16 = smov %s1012_s20  ;;  %18 = sbr.rel (!%p16_p2) target bundleno = 6 (0x6), region = 88 }
 0x203   :  { %516 = vsyncpa [#allocation4], 1 }
 0x204   :  { %518 = vsyncpa [#allocation4 + $0x1], 1 }
 0x205   :  { %519 = vsyncpa [#allocation5], 1 }
 0x206   :  { %521 = vsyncpa [#allocation5 + $0x1], 1 }

</bundles_post_ra>
